<compile_context>
chip_gen: v6e
topology: v6e:2x2x1
jax: 0.10.0
libtpu: 0.0.40
codegen_flags: <defaults>
</compile_context>

<pallas_src>
import jax
import jax.numpy as jnp
from jax import lax
from jax.experimental import pallas as pl
from jax.experimental.pallas import tpu as pltpu

# ----- configuration (mirrors the conf dict fields the forward uses) -----
BOARD_SIZE = 3
N_CLASSES = BOARD_SIZE * BOARD_SIZE          # 9 output classes
IN_CH = BOARD_SIZE * BOARD_SIZE              # Conv2d in_channels = board^2
H1 = H2 = H3 = H4 = H5 = 32                  # hidden_dim_1 .. hidden_dim_5
ACTS = ("ReLU", "Tanh", "ReLU", "Sigmoid", "Leaky ReLU")  # activation_function1..5
KH = KW = 3
SPATIAL = 4                                  # H = W = 4 -> conv 2x2 -> pool 1x1
N_POOL = (SPATIAL - KH + 1) * (SPATIAL - KW + 1)   # 4 conv positions pooled
K_IN = IN_CH * SPATIAL * SPATIAL             # 144 flattened input features


def _round_up(a, m):
    return (a + m - 1) // m * m


def _apply_act(x, name, *, in_kernel=False):
    if name == "ReLU":
        return jnp.maximum(x, 0.0)
    if name == "Tanh":
        return jnp.tanh(x)
    if name == "Leaky ReLU":
        return jnp.where(x >= 0, x, 0.01 * x)      # nn.LeakyReLU default slope
    if name == "Sigmoid":
        e = jnp.exp(-x)
        # In-kernel: exact EUP reciprocal (exp already on the EUP slot).
        return pl.reciprocal(1.0 + e) if in_kernel else 1.0 / (1.0 + e)
    return x                                        # 'Linear' -> identity


# ----------------------------- Pallas kernel -----------------------------
def cnn_kernel(x_ref, wc_ref, bc_ref, wh_ref, bh_ref, w6_ref, b6_ref, out_ref):
    """One batch tile: fused Conv+MaxPool (single N=128 matmul) -> MLP -> softmax."""
    x = x_ref[...]                                              # (TB, K_IN) bf16

    # Conv2d + MaxPool2d fused: the 3x3 kernel, scattered into the flattened
    # board once per pooled conv position, is packed column-wise into a single
    # (K_IN, 4*H1) slab.  One matmul fills 128 MXU result lanes; the 2x2 max
    # pool becomes 3 maxes over static 32-lane column groups.  The per-channel
    # conv bias commutes with the max, so it is added once after pooling.
    y = jnp.dot(x, wc_ref[...], preferred_element_type=jnp.float32)  # (TB, 4*H1)
    pooled = jnp.maximum(jnp.maximum(y[:, 0 * H1:1 * H1], y[:, 1 * H1:2 * H1]),
                         jnp.maximum(y[:, 2 * H1:3 * H1], y[:, 3 * H1:4 * H1]))
    h = _apply_act(pooled + bc_ref[...], ACTS[0], in_kernel=True)    # act1, f32

    # lin2..lin5 (+ act2..act5) from the stacked weight/bias slabs (f32, tiny).
    for l in range(4):
        h = _apply_act(
            jnp.dot(h, wh_ref[l], preferred_element_type=jnp.float32) + bh_ref[l],
            ACTS[l + 1], in_kernel=True)

    logits = (jnp.dot(h, w6_ref[...], preferred_element_type=jnp.float32)
              + b6_ref[...])

    # softmax(dim=-1); exact reciprocal (EUP) so rows sum to 1 to f32 precision.
    m = jnp.max(logits, axis=-1, keepdims=True)
    e = jnp.exp(logits - m)
    denom = jnp.sum(e, axis=-1, keepdims=True)
    out_ref[...] = e * pl.reciprocal(denom)


# ------------------------------ JAX wrapper ------------------------------
def cnn_forward(x, kparams, *, tile_b=1024, core_parallel=False):
    """x: (B, IN_CH, SPATIAL, SPATIAL) f32 -> (B, N_CLASSES) softmax probs.

    core_parallel=True (v7x only): shard the batch grid axis across the two
    TensorCores via pltpu.CORE_PARALLEL (plain "parallel" does not engage the
    second core).  Default off for single-TC chips / interpret runs.
    """
    wc128, bc, wh_stack, bh_stack, w6, b6 = kparams
    B = x.shape[0]
    # bf16 input stream: halves the dominant HBM read and feeds the MXU's
    # native fast path.  Accumulation / activations stay f32 in the kernel.
    x_flat = x.reshape(B, K_IN).astype(jnp.bfloat16)

    # Batch tile: multiple of 16 sublanes (bf16 packing); ragged final block is
    # handled by Pallas (grid = cdiv) -- no wrapper-side jnp.pad copy.
    tb = _round_up(min(tile_b, B), 16)
    grid = (pl.cdiv(B, tb),)

    const2 = lambda i: (0, 0)
    const3 = lambda i: (0, 0, 0)
    dims = (pltpu.CORE_PARALLEL,) if core_parallel else ("parallel",)
    return pl.pallas_call(
        cnn_kernel,
        out_shape=jax.ShapeDtypeStruct((B, N_CLASSES), jnp.float32),
        grid=grid,
        in_specs=[
            pl.BlockSpec((tb, K_IN), lambda i: (i, 0)),          # batch-tiled input
            pl.BlockSpec((K_IN, N_POOL * H1), const2),           # resident conv slab
            pl.BlockSpec((1, H1), const2),
            pl.BlockSpec((4, H1, H1), const3),
            pl.BlockSpec((4, 1, H1), const3),
            pl.BlockSpec((H5, N_CLASSES), const2),
            pl.BlockSpec((1, N_CLASSES), const2),
        ],
        out_specs=pl.BlockSpec((tb, N_CLASSES), lambda i: (i, 0)),
        compiler_params=pltpu.CompilerParams(dimension_semantics=dims),
    )(x_flat, wc128, bc, wh_stack, bh_stack, w6, b6)


def prepare_kernel_params(params):
    """Pack PyTorch-layout params into the kernel's slab layout (done once)."""
    wc_oihw = params["wc_oihw"]                       # (H1, IN_CH, KH, KW)
    wc_hwio = jnp.transpose(wc_oihw, (1, 2, 3, 0))    # (C, KH, KW, H1)
    ho, wo = SPATIAL - KH + 1, SPATIAL - KW + 1
    slabs = []
    for i in range(ho):
        for j in range(wo):
            wp = jnp.zeros((IN_CH, SPATIAL, SPATIAL, H1), jnp.float32)
            wp = wp.at[:, i:i + KH, j:j + KW, :].set(wc_hwio)
            slabs.append(wp.reshape(K_IN, H1))
    # One (K_IN, 4*H1) bf16 slab: conv + pool become one N=128 matmul + 3 maxes.
    wc128 = jnp.concatenate(slabs, axis=1).astype(jnp.bfloat16)

    wh_stack = jnp.stack([params["w2"], params["w3"],
                          params["w4"], params["w5"]], axis=0)   # (4, 32, 32) f32
    bh_stack = jnp.stack([params["b2"], params["b3"],
                          params["b4"], params["b5"]], axis=0)   # (4, 1, 32) f32
    return (wc128, params["bc"], wh_stack, bh_stack,
            params["w6"], params["b6"])


# ------------------------- pure-JAX reference ----------------------------
def reference_forward(x, params):
    conv = lax.conv_general_dilated(
        x.astype(jnp.float32), params["wc_oihw"], (1, 1), "VALID",
        dimension_numbers=("NCHW", "OIHW", "NCHW"),
        precision=lax.Precision.HIGHEST)
    conv = conv + params["bc"].reshape(1, -1, 1, 1)
    pooled = lax.reduce_window(conv, -jnp.inf, lax.max,
                               (1, 1, 2, 2), (1, 1, 2, 2), "VALID")
    h = pooled.reshape(x.shape[0], -1)          # spatial is 1x1 -> (B, H1)
    h = _apply_act(h, ACTS[0])
    h = _apply_act(h @ params["w2"] + params["b2"], ACTS[1])
    h = _apply_act(h @ params["w3"] + params["b3"], ACTS[2])
    h = _apply_act(h @ params["w4"] + params["b4"], ACTS[3])
    h = _apply_act(h @ params["w5"] + params["b5"], ACTS[4])
    logits = h @ params["w6"] + params["b6"]
    return jax.nn.softmax(logits, axis=-1)


def init_params(key):
    ks = jax.random.split(key, 12)
    return {
        "wc_oihw": 0.1 * jax.random.normal(ks[0], (H1, IN_CH, KH, KW), jnp.float32),
        "bc": 0.1 * jax.random.normal(ks[1], (1, H1), jnp.float32),
        "w2": 0.1 * jax.random.normal(ks[2], (H1, H2), jnp.float32),
        "b2": 0.1 * jax.random.normal(ks[3], (1, H2), jnp.float32),
        "w3": 0.1 * jax.random.normal(ks[4], (H2, H3), jnp.float32),
        "b3": 0.1 * jax.random.normal(ks[5], (1, H3), jnp.float32),
        "w4": 0.1 * jax.random.normal(ks[6], (H3, H4), jnp.float32),
        "b4": 0.1 * jax.random.normal(ks[7], (1, H4), jnp.float32),
        "w5": 0.1 * jax.random.normal(ks[8], (H4, H5), jnp.float32),
        "b5": 0.1 * jax.random.normal(ks[9], (1, H5), jnp.float32),
        "w6": 0.1 * jax.random.normal(ks[10], (H5, N_CLASSES), jnp.float32),
        "b6": 0.1 * jax.random.normal(ks[11], (1, N_CLASSES), jnp.float32),
    }


if __name__ == "__main__":
    key = jax.random.PRNGKey(0)
    pkey, xkey1, xkey2, xkey3 = jax.random.split(key, 4)
    params = init_params(pkey)
    kparams = prepare_kernel_params(params)

    # Small deterministic inputs:
    #   B=2  -> single partial block, B=13 -> batch below one tile,
    #   B=300 with tile_b=128 -> 3-step grid with a ragged final block.
    cases = ((2, 1024, xkey1), (13, 1024, xkey2), (300, 128, xkey3))
    for B, tile_b, xkey in cases:
        x = jax.random.normal(xkey, (B, IN_CH, SPATIAL, SPATIAL), jnp.float32)
        out = jax.block_until_ready(cnn_forward(x, kparams, tile_b=tile_b))
        ref = reference_forward(x, params)
        assert out.shape == (B, N_CLASSES)
        # Exact reciprocal in the kernel -> rows sum to 1 to f32 precision.
        assert jnp.allclose(jnp.sum(out, axis=-1), 1.0, atol=1e-3)
        err = float(jnp.max(jnp.abs(out - ref)))
        # Tolerance accounts for bf16 operands in the conv matmul (f32 accumulate).
        assert jnp.allclose(out, ref, rtol=1e-2, atol=2e-3), (
            "max abs err = %g" % err)

    print("KERNEL_OK")
</pallas_src>

<mosaic_0001>
module attributes {stable_mosaic.version = 11 : i64} {
  func.func @cnn_kernel(%arg0: i32, %arg1: memref<16x144xbf16, #tpu.memory_space<vmem>>, %arg2: memref<144x128xbf16, #tpu.memory_space<vmem>>, %arg3: memref<1x32xf32, #tpu.memory_space<vmem>>, %arg4: memref<4x32x32xf32, #tpu.memory_space<vmem>>, %arg5: memref<4x1x32xf32, #tpu.memory_space<vmem>>, %arg6: memref<32x9xf32, #tpu.memory_space<vmem>>, %arg7: memref<1x9xf32, #tpu.memory_space<vmem>>, %arg8: memref<16x9xf32, #tpu.memory_space<vmem>>) attributes {dimension_semantics = [#tpu.dimension_semantics<parallel>], iteration_bounds = array<i64: 1>, scalar_prefetch = 0 : i64, scratch_operands = 0 : i64, tpu.core_type = #tpu.core_type<tc>, window_params = [{transform_indices = @transform_0, window_bounds = array<i64: 16, 144>}, {pipeline_mode = #tpu.pipeline_mode<synchronous>, transform_indices = @transform_1, window_bounds = array<i64: 144, 128>}, {pipeline_mode = #tpu.pipeline_mode<synchronous>, transform_indices = @transform_2, window_bounds = array<i64: 1, 32>}, {pipeline_mode = #tpu.pipeline_mode<synchronous>, transform_indices = @transform_3, window_bounds = array<i64: 4, 32, 32>}, {pipeline_mode = #tpu.pipeline_mode<synchronous>, transform_indices = @transform_4, window_bounds = array<i64: 4, 1, 32>}, {pipeline_mode = #tpu.pipeline_mode<synchronous>, transform_indices = @transform_5, window_bounds = array<i64: 32, 9>}, {pipeline_mode = #tpu.pipeline_mode<synchronous>, transform_indices = @transform_6, window_bounds = array<i64: 1, 9>}, {transform_indices = @transform_7, window_bounds = array<i64: 16, 9>}]} {
    %c0 = arith.constant 0 : index
    %c0_0 = arith.constant 0 : index
    %0 = vector.load %arg1[%c0, %c0_0] : memref<16x144xbf16, #tpu.memory_space<vmem>>, vector<16x144xbf16>
    %c0_1 = arith.constant 0 : index
    %c0_2 = arith.constant 0 : index
    %1 = vector.load %arg2[%c0_1, %c0_2] : memref<144x128xbf16, #tpu.memory_space<vmem>>, vector<144x128xbf16>
    %cst = arith.constant dense<0.000000e+00> : vector<16x128xf32>
    %2 = tpu.matmul %0, %1, %cst {dimension_numbers = #tpu.dot_dimension_numbers<[1], [0], [0], [1], [0, 0, 1, 1], [], []>} : vector<16x144xbf16>, vector<144x128xbf16>, vector<16x128xf32> -> vector<16x128xf32>
    %3 = vector.extract_strided_slice %2 {offsets = [0, 0], sizes = [16, 32], strides = [1, 1]} : vector<16x128xf32> to vector<16x32xf32>
    %4 = vector.extract_strided_slice %2 {offsets = [0, 32], sizes = [16, 32], strides = [1, 1]} : vector<16x128xf32> to vector<16x32xf32>
    %5 = arith.maximumf %3, %4 : vector<16x32xf32>
    %6 = vector.extract_strided_slice %2 {offsets = [0, 64], sizes = [16, 32], strides = [1, 1]} : vector<16x128xf32> to vector<16x32xf32>
    %7 = vector.extract_strided_slice %2 {offsets = [0, 96], sizes = [16, 32], strides = [1, 1]} : vector<16x128xf32> to vector<16x32xf32>
    %8 = arith.maximumf %6, %7 : vector<16x32xf32>
    %9 = arith.maximumf %5, %8 : vector<16x32xf32>
    %c0_3 = arith.constant 0 : index
    %c0_4 = arith.constant 0 : index
    %10 = vector.load %arg3[%c0_3, %c0_4] : memref<1x32xf32, #tpu.memory_space<vmem>>, vector<1x32xf32>
    %11 = vector.broadcast %10 : vector<1x32xf32> to vector<16x32xf32>
    %12 = arith.addf %9, %11 : vector<16x32xf32>
    %cst_5 = arith.constant 0.000000e+00 : f32
    %13 = vector.broadcast %cst_5 : f32 to vector<16x32xf32>
    %14 = arith.maximumf %12, %13 : vector<16x32xf32>
    %c0_6 = arith.constant 0 : index
    %c0_7 = arith.constant 0 : index
    %c0_8 = arith.constant 0 : index
    %15 = vector.load %arg4[%c0_6, %c0_7, %c0_8] : memref<4x32x32xf32, #tpu.memory_space<vmem>>, vector<1x32x32xf32>
    %16 = vector.shape_cast %15 : vector<1x32x32xf32> to vector<32x32xf32>
    %cst_9 = arith.constant dense<0.000000e+00> : vector<16x32xf32>
    %17 = tpu.matmul %14, %16, %cst_9 {dimension_numbers = #tpu.dot_dimension_numbers<[1], [0], [0], [1], [0, 0, 1, 1], [], []>} : vector<16x32xf32>, vector<32x32xf32>, vector<16x32xf32> -> vector<16x32xf32>
    %c0_10 = arith.constant 0 : index
    %c0_11 = arith.constant 0 : index
    %c0_12 = arith.constant 0 : index
    %18 = vector.load %arg5[%c0_10, %c0_11, %c0_12] : memref<4x1x32xf32, #tpu.memory_space<vmem>>, vector<1x1x32xf32>
    %19 = vector.shape_cast %18 : vector<1x1x32xf32> to vector<1x32xf32>
    %20 = vector.broadcast %19 : vector<1x32xf32> to vector<16x32xf32>
    %21 = arith.addf %17, %20 : vector<16x32xf32>
    %22 = math.tanh %21 : vector<16x32xf32>
    %c1 = arith.constant 1 : index
    %c0_13 = arith.constant 0 : index
    %c0_14 = arith.constant 0 : index
    %23 = vector.load %arg4[%c1, %c0_13, %c0_14] : memref<4x32x32xf32, #tpu.memory_space<vmem>>, vector<1x32x32xf32>
    %24 = vector.shape_cast %23 : vector<1x32x32xf32> to vector<32x32xf32>
    %cst_15 = arith.constant dense<0.000000e+00> : vector<16x32xf32>
    %25 = tpu.matmul %22, %24, %cst_15 {dimension_numbers = #tpu.dot_dimension_numbers<[1], [0], [0], [1], [0, 0, 1, 1], [], []>} : vector<16x32xf32>, vector<32x32xf32>, vector<16x32xf32> -> vector<16x32xf32>
    %c1_16 = arith.constant 1 : index
    %c0_17 = arith.constant 0 : index
    %c0_18 = arith.constant 0 : index
    %26 = vector.load %arg5[%c1_16, %c0_17, %c0_18] : memref<4x1x32xf32, #tpu.memory_space<vmem>>, vector<1x1x32xf32>
    %27 = vector.shape_cast %26 : vector<1x1x32xf32> to vector<1x32xf32>
    %28 = vector.broadcast %27 : vector<1x32xf32> to vector<16x32xf32>
    %29 = arith.addf %25, %28 : vector<16x32xf32>
    %cst_19 = arith.constant 0.000000e+00 : f32
    %30 = vector.broadcast %cst_19 : f32 to vector<16x32xf32>
    %31 = arith.maximumf %29, %30 : vector<16x32xf32>
    %c2 = arith.constant 2 : index
    %c0_20 = arith.constant 0 : index
    %c0_21 = arith.constant 0 : index
    %32 = vector.load %arg4[%c2, %c0_20, %c0_21] : memref<4x32x32xf32, #tpu.memory_space<vmem>>, vector<1x32x32xf32>
    %33 = vector.shape_cast %32 : vector<1x32x32xf32> to vector<32x32xf32>
    %cst_22 = arith.constant dense<0.000000e+00> : vector<16x32xf32>
    %34 = tpu.matmul %31, %33, %cst_22 {dimension_numbers = #tpu.dot_dimension_numbers<[1], [0], [0], [1], [0, 0, 1, 1], [], []>} : vector<16x32xf32>, vector<32x32xf32>, vector<16x32xf32> -> vector<16x32xf32>
    %c2_23 = arith.constant 2 : index
    %c0_24 = arith.constant 0 : index
    %c0_25 = arith.constant 0 : index
    %35 = vector.load %arg5[%c2_23, %c0_24, %c0_25] : memref<4x1x32xf32, #tpu.memory_space<vmem>>, vector<1x1x32xf32>
    %36 = vector.shape_cast %35 : vector<1x1x32xf32> to vector<1x32xf32>
    %37 = vector.broadcast %36 : vector<1x32xf32> to vector<16x32xf32>
    %38 = arith.addf %34, %37 : vector<16x32xf32>
    %cst_26 = arith.constant 0.000000e+00 : f32
    %39 = vector.broadcast %cst_26 : f32 to vector<16x32xf32>
    %40 = arith.subf %39, %38 : vector<16x32xf32>
    %41 = math.exp %40 : vector<16x32xf32>
    %cst_27 = arith.constant 1.000000e+00 : f32
    %42 = vector.broadcast %cst_27 : f32 to vector<16x32xf32>
    %43 = arith.addf %42, %41 : vector<16x32xf32>
    %44 = tpu.reciprocal %43 : vector<16x32xf32> -> vector<16x32xf32>
    %c3 = arith.constant 3 : index
    %c0_28 = arith.constant 0 : index
    %c0_29 = arith.constant 0 : index
    %45 = vector.load %arg4[%c3, %c0_28, %c0_29] : memref<4x32x32xf32, #tpu.memory_space<vmem>>, vector<1x32x32xf32>
    %46 = vector.shape_cast %45 : vector<1x32x32xf32> to vector<32x32xf32>
    %cst_30 = arith.constant dense<0.000000e+00> : vector<16x32xf32>
    %47 = tpu.matmul %44, %46, %cst_30 {dimension_numbers = #tpu.dot_dimension_numbers<[1], [0], [0], [1], [0, 0, 1, 1], [], []>} : vector<16x32xf32>, vector<32x32xf32>, vector<16x32xf32> -> vector<16x32xf32>
    %c3_31 = arith.constant 3 : index
    %c0_32 = arith.constant 0 : index
    %c0_33 = arith.constant 0 : index
    %48 = vector.load %arg5[%c3_31, %c0_32, %c0_33] : memref<4x1x32xf32, #tpu.memory_space<vmem>>, vector<1x1x32xf32>
    %49 = vector.shape_cast %48 : vector<1x1x32xf32> to vector<1x32xf32>
    %50 = vector.broadcast %49 : vector<1x32xf32> to vector<16x32xf32>
    %51 = arith.addf %47, %50 : vector<16x32xf32>
    %cst_34 = arith.constant 0.000000e+00 : f32
    %52 = vector.broadcast %cst_34 : f32 to vector<16x32xf32>
    %53 = arith.cmpf oge, %51, %52 : vector<16x32xf32>
    %cst_35 = arith.constant 0.00999999977 : f32
    %54 = vector.broadcast %cst_35 : f32 to vector<16x32xf32>
    %55 = arith.mulf %54, %51 : vector<16x32xf32>
    %56 = arith.select %53, %51, %55 : vector<16x32xi1>, vector<16x32xf32>
    %c0_36 = arith.constant 0 : index
    %c0_37 = arith.constant 0 : index
    %57 = vector.load %arg6[%c0_36, %c0_37] : memref<32x9xf32, #tpu.memory_space<vmem>>, vector<32x9xf32>
    %cst_38 = arith.constant dense<0.000000e+00> : vector<16x9xf32>
    %58 = tpu.matmul %56, %57, %cst_38 {dimension_numbers = #tpu.dot_dimension_numbers<[1], [0], [0], [1], [0, 0, 1, 1], [], []>} : vector<16x32xf32>, vector<32x9xf32>, vector<16x9xf32> -> vector<16x9xf32>
    %c0_39 = arith.constant 0 : index
    %c0_40 = arith.constant 0 : index
    %59 = vector.load %arg7[%c0_39, %c0_40] : memref<1x9xf32, #tpu.memory_space<vmem>>, vector<1x9xf32>
    %60 = vector.broadcast %59 : vector<1x9xf32> to vector<16x9xf32>
    %61 = arith.addf %58, %60 : vector<16x9xf32>
    %cst_41 = arith.constant dense<0xFF800000> : vector<16xf32>
    %62 = vector.multi_reduction <maximumf>, %61, %cst_41 [1] : vector<16x9xf32> to vector<16xf32>
    %63 = vector.shape_cast %62 : vector<16xf32> to vector<16x1xf32>
    %64 = vector.broadcast %63 : vector<16x1xf32> to vector<16x9xf32>
    %65 = arith.subf %61, %64 : vector<16x9xf32>
    %66 = math.exp %65 : vector<16x9xf32>
    %cst_42 = arith.constant dense<0.000000e+00> : vector<16xf32>
    %67 = vector.multi_reduction <add>, %66, %cst_42 [1] : vector<16x9xf32> to vector<16xf32>
    %68 = vector.shape_cast %67 : vector<16xf32> to vector<16x1xf32>
    %69 = tpu.reciprocal %68 : vector<16x1xf32> -> vector<16x1xf32>
    %70 = vector.broadcast %69 : vector<16x1xf32> to vector<16x9xf32>
    %71 = arith.mulf %66, %70 : vector<16x9xf32>
    %c0_43 = arith.constant 0 : index
    %c0_44 = arith.constant 0 : index
    %72 = vector.load %arg8[%c0_43, %c0_44] : memref<16x9xf32, #tpu.memory_space<vmem>>, vector<16x9xf32>
    tpu.vector_store %arg8[%c0_43, %c0_44], %71 {strides = array<i32>} : memref<16x9xf32, #tpu.memory_space<vmem>>, vector<16x9xf32>,
    return
  }
  func.func @transform_0(%arg0: i32) -> (i32, i32) {
    %c0_i32 = arith.constant 0 : i32
    %c0_i32_0 = arith.constant 0 : i32
    return %arg0, %c0_i32 : i32, i32
  }
  func.func @transform_1(%arg0: i32) -> (i32, i32) {
    %c0_i32 = arith.constant 0 : i32
    %c0_i32_0 = arith.constant 0 : i32
    %c0_i32_1 = arith.constant 0 : i32
    return %c0_i32, %c0_i32_0 : i32, i32
  }
  func.func @transform_2(%arg0: i32) -> (i32, i32) {
    %c0_i32 = arith.constant 0 : i32
    %c0_i32_0 = arith.constant 0 : i32
    %c0_i32_1 = arith.constant 0 : i32
    return %c0_i32, %c0_i32_0 : i32, i32
  }
  func.func @transform_3(%arg0: i32) -> (i32, i32, i32) {
    %c0_i32 = arith.constant 0 : i32
    %c0_i32_0 = arith.constant 0 : i32
    %c0_i32_1 = arith.constant 0 : i32
    %c0_i32_2 = arith.constant 0 : i32
    return %c0_i32, %c0_i32_0, %c0_i32_1 : i32, i32, i32
  }
  func.func @transform_4(%arg0: i32) -> (i32, i32, i32) {
    %c0_i32 = arith.constant 0 : i32
    %c0_i32_0 = arith.constant 0 : i32
    %c0_i32_1 = arith.constant 0 : i32
    %c0_i32_2 = arith.constant 0 : i32
    return %c0_i32, %c0_i32_0, %c0_i32_1 : i32, i32, i32
  }
  func.func @transform_5(%arg0: i32) -> (i32, i32) {
    %c0_i32 = arith.constant 0 : i32
    %c0_i32_0 = arith.constant 0 : i32
    %c0_i32_1 = arith.constant 0 : i32
    return %c0_i32, %c0_i32_0 : i32, i32
  }
  func.func @transform_6(%arg0: i32) -> (i32, i32) {
    %c0_i32 = arith.constant 0 : i32
    %c0_i32_0 = arith.constant 0 : i32
    %c0_i32_1 = arith.constant 0 : i32
    return %c0_i32, %c0_i32_0 : i32, i32
  }
  func.func @transform_7(%arg0: i32) -> (i32, i32) {
    %c0_i32 = arith.constant 0 : i32
    %c0_i32_0 = arith.constant 0 : i32
    return %arg0, %c0_i32 : i32, i32
  }
}

</mosaic_0001>

<bundles_post_ra>
// kernel: tpu_custom_call.1
= control target key start
LH: loop header
LB: loop body
LE: loop exit
PB: predicated region body
PF: predicated region fallthrough
CT: control target
= control target key end

     0   :  { %12 = vsyncpa [#allocation3], 0  ;;  %s1173_s0 = inlined_call_operand.vmem [shape: bf16[2,144], index: 0, kind: input, shape index: {}]   ;;  %s1174_s1 = inlined_call_operand.hbm [shape: bf16[144,128], index: 1, kind: input, shape index: {}]   ;;  %s1175_s2 = inlined_call_operand.vmem [shape: f32[1,32], index: 2, kind: input, shape index: {}]   ;;  %s1176_s3 = inlined_call_operand.hbm [shape: f32[4,32,32], index: 3, kind: input, shape index: {}]   ;;  %s1177_s4 = inlined_call_operand.vmem [shape: f32[4,1,32], index: 4, kind: input, shape index: {}]   ;;  %s1178_s5 = inlined_call_operand.vmem [shape: f32[32,9], index: 5, kind: input, shape index: {}]   ;;  %s1179_s6 = inlined_call_operand.vmem [shape: f32[1,9], index: 6, kind: input, shape index: {}]   ;;  %s1180_s7 = inlined_call_operand.hbm [shape: f32[2,9], index: 7, kind: output, shape index: {}]  }
   0x1   :  { %13 = vsyncpa [#allocation6], 0 }
   0x2   :  { %14 = vsyncpa [#allocation4], 0  ;;  %s1038_s24 = smov [#allocation2]  }
   0x3   :  { %s22_s25 = sshll.u32 %s1038_s24, 4  ;;  %s23_s25 = int_to_ptr.vmem [resolvable:$true] %s22_s25 }
   0x4   :  { %s980_s26 = scalar_lea.vmem %s23_s25, 1152  ;;  %p985_p1 = scmp.lt.s32.totalorder %s23_s25, %s23_s25 }
   0x5   :  { %p981_p0 = scmp.ne.s32.totalorder %s23_s25, %s980_s26  ;;  %p986_p2 = scmp.lt.s32.totalorder %s980_s26, %s980_s26 }
   0x7   :  { %p987_p3 = por %p986_p2, %p985_p1 }
   0x9   :  { %p988_p4 = pnand %p987_p3, %p981_p0 }
   0xb   :  { %991 = shalt.err (!%p988_p4)
}
   0xc   :  { %s1039_s27 = smov 64   ;;  %s1040_s28 = smov 4  }
   0xd   :  { %28 = dma.hbm_to_vmem [thread:$0]  %s1174_s1, 1152, %s23_s25, [#allocation3], %s1039_s27, %s1039_s27, %s1040_s28  }
   0xe   :  { %s1041_s8 = smov [#allocation5]  }
   0xf   :  { %s36_s9 = sshll.u32 %s1041_s8, 4  ;;  %s37_s9 = int_to_ptr.vmem [resolvable:$true] %s36_s9 }
  0x10   :  { %s1000_s10 = scalar_lea.vmem %s37_s9, 2048  ;;  %p1005_p6 = scmp.lt.s32.totalorder %s37_s9, %s37_s9 }
  0x11   :  { %p1001_p5 = scmp.ne.s32.totalorder %s37_s9, %s1000_s10  ;;  %p1006_p7 = scmp.lt.s32.totalorder %s1000_s10, %s1000_s10 }
  0x13   :  { %p1007_p8 = por %p1006_p7, %p1005_p6 }
  0x15   :  { %p1008_p9 = pnand %p1007_p8, %p1001_p5 }
  0x17   :  { %1011 = shalt.err (!%p1008_p9)
}
  0x18   :  { %s1042_s11 = smov 128   ;;  %s1043_s12 = smov 8  }
  0x19   :  { %42 = dma.hbm_to_vmem [thread:$0]  %s1176_s3, 2048, %s37_s9, [#allocation6], %s1042_s11, %s1042_s11, %s1043_s12  }
  0x1a   :  { %1032 = dma.done.wait [#allocation3], 1152  }
  0x1b   :  { %1033 = vsyncadd [#allocation3], 4294966144 }
  0x1c   :  { %1034 = dma.done.wait [#allocation6], 2048  }
  0x1d   :  { %1035 = vsyncadd [#allocation6], 4294965248  ;;  %v1044_v0 = vmov 0   ;;  %v943_v1 = vld [vmem:[#allocation2 + $0x38] sm:$0xff]   ;;  %v1045_v2 = vmov 1966171168   ;;  %v97_v4 = vlaneseq }
  0x1e   :  { %215 = vmatprep.subr.bf16.mxu0 %v1044_v0  ;;  %v95_v3 = vunpack.c.l.s4 %v1045_v2  ;;  %v944_v5 = vld [vmem:[#allocation2 + $0x30] sm:$0xff]   ;;  %v945_v8 = vld [vmem:[#allocation2 + $0x28] sm:$0xff]   ;;  %v946_v9 = vld [vmem:[#allocation2 + $0x20] sm:$0xff]   ;;  %vm211_vm0 = vcmask 130048   ;;  %vm298_vm1 = vcmask 261120   ;;  %vm774_vm4 = vcmask 72704  }
  0x1f   :  { %216 = vmatpush1.bf16.msra.mxu0 %v943_v1  ;;  %v98_v7 = vshrl.u32 %v97_v4, 7  ;;  %v56_v11 = vld [vmem:[%s1173_s0] sm:$0x3]  ;;  %v57_v12 = vld [vmem:[%s1173_s0 + $0x2] sm:$0x3]  ;;  %v947_v26 = vld [vmem:[#allocation2 + $0x18] sm:$0xff]  }
  0x20   :  { %217 = vmatprep.subr.bf16.mxu0 %v1044_v0  ;;  %v96_v6 = vunpack.c.0.s8 %v95_v3  ;;  %v58_v13 = vld [vmem:[%s1173_s0 + $0x4] sm:$0x3]  ;;  %v59_v14 = vld [vmem:[%s1173_s0 + $0x6] sm:$0x3]  ;;  %v60_v15 = vld [vmem:[%s1173_s0 + $0x8] sm:$0x3]  ;;  %v90_v17 = vcombine.low %v56_v11, %v57_v12 }
  0x21   :  { %v61_v16 = vld [vmem:[%s1173_s0 + $0xa] sm:$0x3]  ;;  %v62_v18 = vld [vmem:[%s1173_s0 + $0xc] sm:$0x3]  ;;  %v63_v19 = vld [vmem:[%s1173_s0 + $0xe] sm:$0x3]  ;;  %v91_v20 = vcombine.low %v58_v13, %v59_v14 }
  0x22   :  { %v99_v10 = vsub.s32 %v96_v6, %v98_v7  ;;  %v92_v21 = vcombine.low %v60_v15, %v61_v16  ;;  %v93_v22 = vcombine.low %v62_v18, %v63_v19  ;;  %v948_v31 = vld [vmem:[#allocation2 + $0x10] sm:$0xff]   ;;  %v949_v34 = vld [vmem:[#allocation2 + $0x8] sm:$0xff]   ;;  %v950_v37 = vld [vmem:[#allocation2] sm:$0xff]   ;;  %s1046_s0 = smov 96  }
  0x23   :  { %218 = vmatpush1.bf16.msra.mxu0 %v944_v5  ;;  %v951_v40 = vld [vmem:[#allocation2 + $0x40] sm:$0xff]   ;;  %v289_v47 = vld [vmem:[#allocation5 + $0x10] sm:$0xff]  ;;  %v288_v48 = vld [vmem:[#allocation5 + $0x8] sm:$0xff] }
  0x24   :  { %219 = vmatprep.subr.bf16.mxu0 %v1044_v0  ;;  %v100_v23 = vrot.slane %v90_v17, %v99_v10  ;;  %v107_v24 = vrot.slane %v91_v20, %v99_v10  ;;  %v114_v25 = vrot.slane %v92_v21, %v99_v10  ;;  %v121_v27 = vrot.slane %v93_v22, %v99_v10  ;;  %v290_v46 = vld [vmem:[#allocation5 + $0x18] sm:$0xff]  ;;  %v287_v49 = vld [vmem:[#allocation5] sm:$0xff]  ;;  %v384_v1 = vld [vmem:[#allocation5 + $0x28] sm:$0xff] }
  0x25   :  { %876 = vmatprep.subr.mxu1 %v290_v46  ;;  %v827_v55 = vld [vmem:[%s1175_s2] ss:$0 sm:$0xff]  ;;  %v383_v2 = vld [vmem:[#allocation5 + $0x20] sm:$0xff]  ;;  %v481_v11 = vld [vmem:[#allocation5 + $0x50] sm:$0xff] }
  0x26   :  { %v123_v28 = vcombine.high %v100_v23, %v107_v24  ;;  %v125_v29 = vcombine.high %v114_v25, %v121_v27  ;;  %v122_v35 = vcombine.low %v100_v23, %v107_v24  ;;  %v124_v36 = vcombine.low %v114_v25, %v121_v27  ;;  %877 = vmatpush3.msra.mxu1 %v290_v46  ;;  %v386_v63 = vld [vmem:[#allocation5 + $0x38] sm:$0xff]  ;;  %v480_v12 = vld [vmem:[#allocation5 + $0x48] sm:$0xff]  ;;  %v479_v13 = vld [vmem:[#allocation5 + $0x40] sm:$0xff] }
  0x27   :  { %220 = vmatpush1.bf16.msra.mxu0 %v945_v8  ;;  %878 = vmatprep.subr.mxu1 %v289_v47  ;;  %v828_v3 = vld [vmem:[%s1177_s4] ss:$0 sm:$0xff]  ;;  %v832_v14 = vld [vmem:[%s1177_s4 + $0x1] ss:$0 sm:$0xff]  ;;  %v585_v22 = vld [vmem:[#allocation5 + $0x70] sm:$0xff] }
  0x28   :  { %221 = vmatprep.subr.bf16.mxu0 %v1044_v0  ;;  %v139_v30 = vrot.slane %v123_v28, %v99_v10  ;;  %v153_v32 = vrot.slane %v125_v29, %v99_v10  ;;  %v132_v38 = vrot.slane %v122_v35, %v99_v10  ;;  %v146_v39 = vrot.slane %v124_v36, %v99_v10  ;;  %v482_v10 = vld [vmem:[#allocation5 + $0x58] sm:$0xff]  ;;  %v584_v23 = vld [vmem:[#allocation5 + $0x68] sm:$0xff]  ;;  %v583_v24 = vld [vmem:[#allocation5 + $0x60] sm:$0xff] }
  0x29   :  { %879 = vmatpush3.msra.mxu1 %v289_v47  ;;  %v586_v21 = vld [vmem:[#allocation5 + $0x78] sm:$0xff] }
  0x2a   :  { %v155_v33 = vcombine.low %v139_v30, %v153_v32  ;;  %v154_v41 = vcombine.low %v132_v38, %v146_v39  ;;  %880 = vmatprep.subr.mxu1 %v288_v48  ;;  %v836_v25 = vld [vmem:[%s1177_s4 + $0x2] ss:$0 sm:$0xff] }
  0x2b   :  { %222 = vmatpush1.bf16.msra.mxu0 %v946_v9  ;;  %881 = vmatpush3.msra.mxu1 %v288_v48 }
  0x2c   :  { %223 = vmatprep.subr.bf16.mxu0 %v1044_v0  ;;  %826 = vmatprep.mubr.msk.bf16.mxu0 %vm211_vm0, %v155_v33 }
  0x2d   :  { %882 = vmatprep.subr.mxu1 %v287_v49 }
  0x2e   :  { %883 = vmatpush3.msra.mxu1 %v287_v49 }
  0x2f   :  { %224 = vmatpush1.bf16.msra.mxu0 %v947_v26  ;;  %887 = vmatprep.subr.mxu1 %v386_v63 }
  0x30   :  { %225 = vmatprep.subr.bf16.mxu0 %v1044_v0 }
  0x33   :  { %226 = vmatpush1.bf16.msra.mxu0 %v948_v31 }
  0x34   :  { %227 = vmatprep.subr.bf16.mxu0 %v1044_v0 }
  0x37   :  { %228 = vmatpush1.bf16.msra.mxu0 %v949_v34 }
  0x38   :  { %229 = vmatprep.subr.bf16.mxu0 %v1044_v0 }
  0x3b   :  { %230 = vmatpush1.bf16.msra.mxu0 %v950_v37 }
  0x3c   :  { %245 = vmatprep.subr.bf16.mxu0 %v1044_v0  ;;  %v385_v0 = vld [vmem:[#allocation5 + $0x30] sm:$0xff] }
  0x3f   :  { %246 = vmatpush2.bf16.msra.mxu0 %v951_v40  ;;  %v685_v40 = vld [vmem:[%s1178_s5 + $0x18] sm:$0xff] }
  0x42   :  { %248 = vmatmul.mubr.bf16.vlgmr.msra.gmra.mxu0 %v154_v41  ;;  %v684_v41 = vld [vmem:[%s1178_s5 + $0x10] sm:$0xff] }
 0x102   :  { %v249_v42 = vpop.f32.mrf.mxu0 }
 0x103   :  { %258 = vrot.lane.b32.xlu0 %v249_v42, %s1046_s0 }
 0x104   :  { %v251_v43 = vpop.f32.mrf.mxu0 }
 0x105   :  { %v682_v43 = vld [vmem:[%s1178_s5] sm:$0xff] }
 0x106   :  { %v252_v44 = vpop.f32.mrf.mxu0 }
 0x107   :  { %260 = vrot.lane.b32.xlu0 %v252_v44, %s1046_s0 }
 0x108   :  { %v254_v45 = vpop.f32.mrf.mxu0 }
 0x175   :  { %v259_v50 = vpop.permute.xlu0 %258 }
 0x176   :  { %v264_v51 = vmax.f32 %v249_v42, %v259_v50  ;;  %v683_v42 = vld [vmem:[%s1178_s5 + $0x8] sm:$0xff] }
 0x178   :  { %268 = vrot.lane.b32.xlu1 %v264_v51, %s1039_s27 }
 0x179   :  { %v261_v52 = vpop.permute.xlu0 %260 }
 0x17a   :  { %v265_v53 = vmax.f32 %v252_v44, %v261_v52  ;;  %v840_v44 = vld [vmem:[%s1177_s4 + $0x3] ss:$0 sm:$0xff] }
 0x17c   :  { %270 = vrot.lane.b32.xlu1 %v265_v53, %s1039_s27 }
 0x1ea   :  { %v269_v54 = vpop.permute.xlu1 %268 }
 0x1eb   :  { %v274_v56 = vmax.f32 %v264_v51, %v269_v54 }
 0x1ed   :  { %v283_v57 = vadd.f32 %v827_v55, %v274_v56 }
 0x1ee   :  { %v271_v58 = vpop.permute.xlu1 %270 }
 0x1ef   :  { %v275_v59 = vmax.f32 %v265_v53, %v271_v58  ;;  %v285_v60 = vmax.f32 %v283_v57, 0.0  ;;  %v843_v53 = vld [vmem:[%s1179_s6] ss:$0 sm:$0xff] }
 0x1f1   :  { %v284_v61 = vadd.f32 %v827_v55, %v275_v59  ;;  %884 = vmatprep.mubr.msk.f32.mxu1 %vm298_vm1, %v285_v60 }
 0x1f3   :  { %v286_v62 = vmax.f32 %v284_v61, 0.0 }
 0x1f5   :  { %885 = vmatmul.mubr.msk.f32.vlgmr.msra.gmra.mxu1 %vm298_vm1, %v286_v62 }
 0x1f6   :  { %888 = vmatpush3.msra.mxu1 %v386_v63 }
 0x1f7   :  { %889 = vmatprep.subr.mxu1 %v385_v0 }
 0x1f8   :  { %890 = vmatpush3.msra.mxu1 %v385_v0 }
 0x1f9   :  { %891 = vmatprep.subr.mxu1 %v384_v1 }
 0x1fa   :  { %892 = vmatpush3.msra.mxu1 %v384_v1 }
 0x1fb   :  { %893 = vmatprep.subr.mxu1 %v383_v2 }
 0x1fc   :  { %894 = vmatpush3.msra.mxu1 %v383_v2 }
 0x1fd   :  { %898 = vmatprep.subr.mxu1 %v482_v10 }
 0x2b5   :  { %v886_v4 = vpop.f32.mrf.mxu1 }
 0x2b6   :  { %v377_v5 = vadd.f32 %v886_v4, %v828_v3 }
 0x2b7   :  { %v371_v6 = vpop.f32.mrf.mxu1 }
 0x2b8   :  { %v372_v7 = vadd.f32 %v828_v3, %v371_v6 }
 0x2ba   :  { %952 = vtanh.f32 %v372_v7 }
 0x2bb   :  { %954 = vtanh.f32 %v377_v5 }
 0x2c7   :  { %v953_v8 = vpop.eup %952 }
 0x2c8   :  { %v955_v9 = vpop.eup %954  ;;  %895 = vmatprep.mubr.msk.f32.mxu1 %vm298_vm1, %v953_v8 }
 0x2c9   :  { %896 = vmatmul.mubr.msk.f32.vlgmr.msra.gmra.mxu1 %vm298_vm1, %v955_v9 }
 0x2ca   :  { %899 = vmatpush3.msra.mxu1 %v482_v10 }
 0x2cb   :  { %900 = vmatprep.subr.mxu1 %v481_v11 }
 0x2cc   :  { %901 = vmatpush3.msra.mxu1 %v481_v11 }
 0x2cd   :  { %902 = vmatprep.subr.mxu1 %v480_v12 }
 0x2ce   :  { %903 = vmatpush3.msra.mxu1 %v480_v12 }
 0x2cf   :  { %904 = vmatprep.subr.mxu1 %v479_v13 }
 0x2d0   :  { %905 = vmatpush3.msra.mxu1 %v479_v13 }
 0x2d1   :  { %909 = vmatprep.subr.mxu1 %v586_v21 }
 0x389   :  { %v897_v15 = vpop.f32.mrf.mxu1 }
 0x38a   :  { %v473_v16 = vadd.f32 %v897_v15, %v832_v14 }
 0x38b   :  { %v467_v17 = vpop.f32.mrf.mxu1 }
 0x38c   :  { %v468_v18 = vadd.f32 %v832_v14, %v467_v17  ;;  %v477_v20 = vmax.f32 %v473_v16, 0.0 }
 0x38e   :  { %v476_v19 = vmax.f32 %v468_v18, 0.0 }
 0x390   :  { %906 = vmatprep.mubr.msk.f32.mxu1 %vm298_vm1, %v476_v19 }
 0x391   :  { %907 = vmatmul.mubr.msk.f32.vlgmr.msra.gmra.mxu1 %vm298_vm1, %v477_v20 }
 0x392   :  { %910 = vmatpush3.msra.mxu1 %v586_v21 }
 0x393   :  { %911 = vmatprep.subr.mxu1 %v585_v22 }
 0x394   :  { %912 = vmatpush3.msra.mxu1 %v585_v22 }
 0x395   :  { %913 = vmatprep.subr.mxu1 %v584_v23 }
 0x396   :  { %914 = vmatpush3.msra.mxu1 %v584_v23 }
 0x397   :  { %915 = vmatprep.subr.mxu1 %v583_v24 }
 0x398   :  { %916 = vmatpush3.msra.mxu1 %v583_v24 }
 0x399   :  { %920 = vmatprep.subr.mxu1 %v685_v40 }
 0x451   :  { %v908_v26 = vpop.f32.mrf.mxu1 }
 0x452   :  { %v569_v27 = vadd.f32 %v908_v26, %v836_v25 }
 0x453   :  { %v563_v28 = vpop.f32.mrf.mxu1 }
 0x454   :  { %v573_v29 = vsub.f32 0.0, %v569_v27  ;;  %v564_v30 = vadd.f32 %v836_v25, %v563_v28 }
 0x456   :  { %v576_v31 = vmul.f32 1.442695, %v573_v29  ;;  %v572_v32 = vsub.f32 0.0, %v564_v30 }
 0x458   :  { %956 = vpow2.f32 %v576_v31  ;;  %v574_v33 = vmul.f32 1.442695, %v572_v32 }
 0x45a   :  { %958 = vpow2.f32 %v574_v33 }
 0x465   :  { %v957_v34 = vpop.eup %956 }
 0x466   :  { %v579_v36 = vadd.f32 1.0, %v957_v34 }
 0x467   :  { %v959_v35 = vpop.eup %958 }
 0x468   :  { %v578_v37 = vadd.f32 1.0, %v959_v35 }
 0x46a   :  { %960 = vrcp.f32 %v578_v37 }
 0x46b   :  { %962 = vrcp.f32 %v579_v36 }
 0x477   :  { %v961_v38 = vpop.eup %960 }
 0x478   :  { %v963_v39 = vpop.eup %962  ;;  %917 = vmatprep.mubr.msk.f32.mxu1 %vm298_vm1, %v961_v38 }
 0x479   :  { %918 = vmatmul.mubr.msk.f32.vlgmr.msra.gmra.mxu1 %vm298_vm1, %v963_v39 }
 0x47a   :  { %921 = vmatpush3.msra.mxu1 %v685_v40 }
 0x47b   :  { %922 = vmatprep.subr.mxu1 %v684_v41 }
 0x47c   :  { %923 = vmatpush3.msra.mxu1 %v684_v41 }
 0x47d   :  { %924 = vmatprep.subr.mxu1 %v683_v42 }
 0x47e   :  { %925 = vmatpush3.msra.mxu1 %v683_v42 }
 0x47f   :  { %926 = vmatprep.subr.mxu1 %v682_v43 }
 0x480   :  { %927 = vmatpush3.msra.mxu1 %v682_v43 }
 0x539   :  { %v919_v45 = vpop.f32.mrf.mxu1 }
 0x53a   :  { %v673_v46 = vadd.f32 %v919_v45, %v840_v44 }
 0x53b   :  { %v667_v47 = vpop.f32.mrf.mxu1 }
 0x53c   :  { %v668_v48 = vadd.f32 %v840_v44, %v667_v47  ;;  %v679_v49 = vmul.f32 0.01, %v673_v46  ;;  %vm677_vm2 = vcmp.ge.f32.partialorder %v673_v46, 0.0 }
 0x53e   :  { %vm676_vm3 = vcmp.ge.f32.partialorder %v668_v48, 0.0  ;;  %v678_v50 = vmul.f32 0.01, %v668_v48  ;;  %v681_v52 = vsel %vm677_vm2, %v673_v46, %v679_v49 }
 0x540   :  { %v680_v51 = vsel %vm676_vm3, %v668_v48, %v678_v50 }
 0x541   :  { %928 = vmatprep.mubr.msk.f32.mxu1 %vm298_vm1, %v680_v51 }
 0x542   :  { %929 = vmatmul.mubr.msk.f32.vlgmr.msra.gmra.mxu1 %vm298_vm1, %v681_v52 }
 0x602   :  { %v930_v54 = vpop.f32.mrf.mxu1 }
 0x603   :  { %v771_v55 = vadd.f32 %v930_v54, %v843_v53 }
 0x604   :  { %v765_v56 = vpop.f32.mrf.mxu1 }
 0x605   :  { %v766_v57 = vadd.f32 %v843_v53, %v765_v56  ;;  %v778_v58 = vsel %vm774_vm4, %v771_v55, -inf }
 0x606   :  { %779 = vmax.xlane.f32.xlu1 %v778_v58 }
 0x607   :  { %v775_v59 = vsel %vm774_vm4, %v766_v57, -inf }
 0x608   :  { %776 = vmax.xlane.f32.xlu0 %v775_v59 }
 0x68f   :  { %v780_v60 = vpop.xlane.xlu1 %779 }
 0x690   :  { %v782_v61 = vsub.f32 %v771_v55, %v780_v60 }
 0x691   :  { %v777_v62 = vpop.xlane.xlu0 %776 }
 0x692   :  { %v781_v63 = vsub.f32 %v766_v57, %v777_v62  ;;  %v785_v0 = vmul.f32 1.442695, %v782_v61 }
 0x694   :  { %v783_v1 = vmul.f32 1.442695, %v781_v63 }
 0x696   :  { %964 = vpow2.f32 %v783_v1 }
 0x697   :  { %966 = vpow2.f32 %v785_v0 }
 0x6a3   :  { %v965_v2 = vpop.eup %964 }
 0x6a4   :  { %v787_v3 = vsel %vm774_vm4, %v965_v2, 0.0  ;;  %v967_v4 = vpop.eup %966 }
 0x6a5   :  { %788 = vadd.xlane.f32.xlu0 %v787_v3  ;;  %v790_v5 = vsel %vm774_vm4, %v967_v4, 0.0 }
 0x6a9   :  { %791 = vadd.xlane.f32.xlu0 %v790_v5 }
 0x72e   :  { %v789_v6 = vpop.xlane.xlu0 %788 }
 0x72f   :  { %968 = vrcp.f32 %v789_v6 }
 0x732   :  { %v792_v7 = vpop.xlane.xlu0 %791 }
 0x733   :  { %970 = vrcp.f32 %v792_v7 }
 0x73c   :  { %v969_v8 = vpop.eup %968 }
 0x73d   :  { %v795_v9 = vmul.f32 %v969_v8, %v965_v2 }
 0x73f   :  { %797 = vst.msk [vmem:[#allocation7] sm:$0xff] %vm774_vm4, %v795_v9 }
 0x740   :  { %v971_v10 = vpop.eup %970 }
 0x741   :  { %v796_v11 = vmul.f32 %v971_v10, %v967_v4 }
 0x743   :  { %798 = vst.msk [vmem:[#allocation7 + $0x8] sm:$0xff] %vm774_vm4, %v796_v11 }
 0x744   :  { %803 = vsyncadd [#allocation4], 224  ;;  %s1047_s4 = smov [#allocation7]  }
 0x745   :  { %s804_s6 = sshll.u32 %s1047_s4, 4  ;;  %s805_s6 = int_to_ptr.vmem [resolvable:$true] %s804_s6 }
 0x746   :  { %s1012_s22 = scalar_lea.vmem %s805_s6, 32  ;;  %s1016_s23 = scalar_lea.vmem %s805_s6, 256 }
 0x747   :  { %p1013_p10 = scmp.ne.s32.totalorder %s805_s6, %s1012_s22  ;;  %p1017_p11 = scmp.lt.s32.totalorder %s805_s6, %s805_s6 }
 0x748   :  { %p1018_p12 = scmp.lt.s32.totalorder %s1016_s23, %s1012_s22 }
 0x74a   :  { %p1019_p13 = por %p1018_p12, %p1017_p11 }
 0x74c   :  { %p1020_p0 = pnand %p1019_p13, %p1013_p10 }
 0x74e   :  { %1023 = shalt.err (!%p1020_p0)
}
 0x74f   :  { %s1048_s24 = smov 32   ;;  %s1049_s25 = smov 2  }
 0x750   :  { %810 = dma.vmem_to_hbm [thread:$0]  %s805_s6, 32, %s1180_s7, [#allocation4], %s1048_s24, %s1048_s24, %s1049_s25  }
 0x751   :  { %1036 = dma.done.wait [#allocation4], 256  }
 0x752   :  { %1037 = vsyncadd [#allocation4], 4294967040 }
 0x753   :  { %814 = vsyncpa [#allocation3], 1 }
 0x754   :  { %815 = vsyncpa [#allocation6], 1 }
 0x755   :  { %816 = vsyncpa [#allocation4], 1 }

</bundles_post_ra>
